<compile_context>
chip_gen: v7x
topology: tpu7x:2x2x1
jax: 0.10.0
libtpu: 0.0.40
codegen_flags: <defaults>
</compile_context>

<pallas_src>
import jax
import jax.numpy as jnp
import numpy as np
from jax.experimental import pallas as pl
from jax.experimental.pallas import tpu as pltpu

# --- synthetic "policy_spec" constants (MultiDiscrete action space) ----------
NVEC = (3, 5)                    # discrete_actions = policy_spec.action_space.nvec
NUM_LOGITS = int(sum(NVEC))      # FCNet logits width
N_BRANCHES = len(NVEC)
VERSION_NUMBER = 3.0
MEMORY_SIZE = 0.0

LANE = 128                       # lane-dense output slab width
assert NUM_LOGITS + N_BRANCHES <= LANE


# ----------------------------- Pallas kernel --------------------------------
def _fcnet_sampler_kernel(x1_ref, x2_ref, w1a_ref, w1b_ref, b1_ref,
                          w2_ref, b2_ref, wl_ref, bl_ref, mask_ref,
                          out_ref):
    # hidden layer 1 (split-K over the two obs components), bf16 -> f32 acc
    h1 = jnp.tanh(
        jnp.dot(x1_ref[...], w1a_ref[...], preferred_element_type=jnp.float32)
        + jnp.dot(x2_ref[...], w1b_ref[...], preferred_element_type=jnp.float32)
        + b1_ref[...])
    # hidden layer 2
    h2 = jnp.tanh(
        jnp.dot(h1.astype(jnp.bfloat16), w2_ref[...],
                preferred_element_type=jnp.float32) + b2_ref[...])
    # logits head, padded to 128 output columns -> lane-dense result
    logits_full = (jnp.dot(h2.astype(jnp.bfloat16), wl_ref[...],
                           preferred_element_type=jnp.float32) + bl_ref[...])
    # one dense (BT, 128) store; cols [0:L] hold the real logits, rest are 0
    out_ref[...] = logits_full

    # action_distribution_sampler: masked argmax per MultiDiscrete branch
    logits = logits_full[:, :NUM_LOGITS]
    masked = jnp.where(mask_ref[...] > 0.5, logits, jnp.float32(-1e9))
    idx = jax.lax.broadcasted_iota(jnp.int32, masked.shape, 1)   # shared iota
    acts = []
    off = 0
    for n in NVEC:
        seg = masked[:, off:off + n]                 # (BT, n) static slice
        seg_idx = idx[:, off:off + n] - off          # 0..n-1
        mx = jnp.max(seg, axis=-1, keepdims=True)
        # first index attaining the max (argmax tie-break)
        first = jnp.min(jnp.where(seg == mx, seg_idx, jnp.int32(n)),
                        axis=-1, keepdims=True)      # (BT, 1) int32
        acts.append(first)
        off += n
    acts_f32 = jnp.concatenate(acts, axis=-1).astype(jnp.float32)   # (BT, NB)
    # pack actions into the same lane-dense slab, cols [L : L+NB]
    out_ref[:, NUM_LOGITS:NUM_LOGITS + N_BRANCHES] = acts_f32


# ------------------------------ wrapper --------------------------------------
def _round_up(v, m):
    return (v + m - 1) // m * m


def rllib_wrapper_forward(obs_list, mask, params, *, batch_tile=256):
    """Mirrors RLLibTorchModelWrapper.forward(inputs) with inputs=(obs_list, mask)."""
    assert len(obs_list) >= 2, "expected at least two observation components"
    x1 = obs_list[0].astype(jnp.bfloat16)
    x2 = (obs_list[1] if len(obs_list) == 2
          else jnp.concatenate(obs_list[1:], axis=1)).astype(jnp.bfloat16)

    w1, b1, w2, b2, wl, bl = params
    B, D1 = x1.shape
    D2 = x2.shape[1]
    H = w1.shape[1]

    # split-K first-layer weights, bf16 weights (MXU), f32 biases
    w1a = w1[:D1].astype(jnp.bfloat16)
    w1b = w1[D1:].astype(jnp.bfloat16)
    w2b = w2.astype(jnp.bfloat16)
    b1f = b1.astype(jnp.float32)
    b2f = b2.astype(jnp.float32)
    # logits head padded to a lane-dense 128-wide output
    wl_pad = jnp.zeros((H, LANE), jnp.bfloat16).at[:, :NUM_LOGITS].set(
        wl.astype(jnp.bfloat16))
    bl_pad = jnp.zeros((1, LANE), jnp.float32).at[:, :NUM_LOGITS].set(
        bl.astype(jnp.float32))

    # batch tiling: stream rows, keep weights resident (sized well under the
    # 32 MiB scoped / 64 MiB physical VMEM budget of v7x even at tile=256)
    bt = min(batch_tile, _round_up(B, 8))
    b_pad = _round_up(B, bt)
    if b_pad != B:
        padn = b_pad - B
        x1 = jnp.pad(x1, ((0, padn), (0, 0)))
        x2 = jnp.pad(x2, ((0, padn), (0, 0)))
        mask = jnp.pad(mask, ((0, padn), (0, 0)))
    mask = mask.astype(jnp.float32)

    grid = (b_pad // bt,)

    def row_spec(d):
        return pl.BlockSpec((bt, d), lambda i: (i, 0))

    def res_spec(shape):                       # weights: constant block -> stay in VMEM
        return pl.BlockSpec(shape, lambda i: (0, 0))

    flops = 2 * b_pad * (D1 * H + D2 * H + H * H + H * LANE)
    bytes_accessed = int(
        2 * (x1.size + x2.size + w1a.size + w1b.size + w2b.size + wl_pad.size)
        + 4 * (b1f.size + b2f.size + bl_pad.size + mask.size + b_pad * LANE))

    slab = pl.pallas_call(
        _fcnet_sampler_kernel,
        out_shape=jax.ShapeDtypeStruct((b_pad, LANE), jnp.float32),
        grid=grid,
        in_specs=[row_spec(D1), row_spec(D2),
                  res_spec(w1a.shape), res_spec(w1b.shape), res_spec(b1f.shape),
                  res_spec(w2b.shape), res_spec(b2f.shape),
                  res_spec(wl_pad.shape), res_spec(bl_pad.shape),
                  row_spec(NUM_LOGITS)],
        out_specs=row_spec(LANE),
        compiler_params=pltpu.CompilerParams(
            dimension_semantics=("parallel",)),
        cost_estimate=pl.CostEstimate(
            flops=flops,
            transcendentals=2 * b_pad * H,
            bytes_accessed=bytes_accessed),
    )(x1, x2, w1a, w1b, b1f, w2b, b2f, wl_pad, bl_pad, mask)

    logits = slab[:B, :NUM_LOGITS]
    sampled_disc = slab[:B, NUM_LOGITS:NUM_LOGITS + N_BRANCHES].astype(jnp.int32)

    # registered buffers (constants)
    version_number = jnp.array([VERSION_NUMBER], jnp.float32)
    memory_size_vector = jnp.array([MEMORY_SIZE], jnp.float32)
    discrete_act_size_vector = jnp.array([list(NVEC)], jnp.float32)

    return sampled_disc, version_number, memory_size_vector, discrete_act_size_vector, logits


# ------------------------------ reference ------------------------------------
def ref_forward(obs_list, mask, params):
    """Pure-JAX reference mirroring the kernel math (bf16 matmul inputs, f32 acc)."""
    x1 = obs_list[0].astype(jnp.bfloat16)
    x2 = (obs_list[1] if len(obs_list) == 2
          else jnp.concatenate(obs_list[1:], axis=1)).astype(jnp.bfloat16)
    w1, b1, w2, b2, wl, bl = params
    D1 = x1.shape[1]
    w1a = w1[:D1].astype(jnp.bfloat16)
    w1b = w1[D1:].astype(jnp.bfloat16)
    h1 = jnp.tanh(jnp.dot(x1, w1a, preferred_element_type=jnp.float32)
                  + jnp.dot(x2, w1b, preferred_element_type=jnp.float32) + b1)
    h2 = jnp.tanh(jnp.dot(h1.astype(jnp.bfloat16), w2.astype(jnp.bfloat16),
                          preferred_element_type=jnp.float32) + b2)
    logits = (jnp.dot(h2.astype(jnp.bfloat16), wl.astype(jnp.bfloat16),
                      preferred_element_type=jnp.float32) + bl)
    masked = jnp.where(mask > 0.5, logits, -1e9)
    acts, off = [], 0
    for n in NVEC:
        acts.append(jnp.argmax(masked[:, off:off + n], axis=-1).astype(jnp.int32))
        off += n
    return logits, jnp.stack(acts, axis=-1)


# -------------------------------- main ----------------------------------------
if __name__ == "__main__":
    key = jax.random.PRNGKey(0)
    B, D1, D2, H = 2, 12, 20, 32          # obs components concat -> D = 32

    ks = jax.random.split(key, 9)
    obs1 = jax.random.normal(ks[0], (B, D1), jnp.float32)
    obs2 = jax.random.normal(ks[1], (B, D2), jnp.float32)

    # deterministic parameter init (FCNet: two hidden layers + logits head)
    D = D1 + D2
    w1 = jax.random.normal(ks[2], (D, H), jnp.float32) * 0.1
    b1 = jax.random.normal(ks[3], (1, H), jnp.float32) * 0.01
    w2 = jax.random.normal(ks[4], (H, H), jnp.float32) * 0.1
    b2 = jax.random.normal(ks[5], (1, H), jnp.float32) * 0.01
    wl = jax.random.normal(ks[6], (H, NUM_LOGITS), jnp.float32) * 0.1
    bl = jax.random.normal(ks[7], (1, NUM_LOGITS), jnp.float32) * 0.01
    params = (w1, b1, w2, b2, wl, bl)

    # action mask: disallow action 0 of branch 0 and action 1 of branch 1
    mask = jnp.ones((B, NUM_LOGITS), jnp.float32)
    mask = mask.at[:, 0].set(0.0)
    mask = mask.at[:, NVEC[0] + 1].set(0.0)

    outs = rllib_wrapper_forward([obs1, obs2], mask, params)
    outs = jax.block_until_ready(outs)
    sampled_disc, version_number, memory_size_vector, discrete_act_size_vector, logits = outs

    ref_logits, ref_actions = ref_forward([obs1, obs2], mask, params)
    np.testing.assert_allclose(np.asarray(logits), np.asarray(ref_logits),
                               rtol=1e-4, atol=1e-4)
    np.testing.assert_array_equal(np.asarray(sampled_disc), np.asarray(ref_actions))
    assert sampled_disc.shape == (B, N_BRANCHES)
    assert version_number.shape == (1,) and float(version_number[0]) == VERSION_NUMBER
    assert memory_size_vector.shape == (1,) and float(memory_size_vector[0]) == MEMORY_SIZE
    assert discrete_act_size_vector.shape == (1, N_BRANCHES)

    print("KERNEL_OK")
</pallas_src>

<mosaic_0001>
module attributes {stable_mosaic.version = 11 : i64} {
  func.func @_fcnet_sampler_kernel(%arg0: i32, %arg1: memref<8x12xbf16, #tpu.memory_space<vmem>>, %arg2: memref<8x20xbf16, #tpu.memory_space<vmem>>, %arg3: memref<12x32xbf16, #tpu.memory_space<vmem>>, %arg4: memref<20x32xbf16, #tpu.memory_space<vmem>>, %arg5: memref<1x32xf32, #tpu.memory_space<vmem>>, %arg6: memref<32x32xbf16, #tpu.memory_space<vmem>>, %arg7: memref<1x32xf32, #tpu.memory_space<vmem>>, %arg8: memref<32x128xbf16, #tpu.memory_space<vmem>>, %arg9: memref<1x128xf32, #tpu.memory_space<vmem>>, %arg10: memref<8x8xf32, #tpu.memory_space<vmem>>, %arg11: memref<8x128xf32, #tpu.memory_space<vmem>>) attributes {dimension_semantics = [#tpu.dimension_semantics<parallel>], iteration_bounds = array<i64: 1>, scalar_prefetch = 0 : i64, scratch_operands = 0 : i64, tpu.core_type = #tpu.core_type<tc>, window_params = [{transform_indices = @transform_0, window_bounds = array<i64: 8, 12>}, {transform_indices = @transform_1, window_bounds = array<i64: 8, 20>}, {pipeline_mode = #tpu.pipeline_mode<synchronous>, transform_indices = @transform_2, window_bounds = array<i64: 12, 32>}, {pipeline_mode = #tpu.pipeline_mode<synchronous>, transform_indices = @transform_3, window_bounds = array<i64: 20, 32>}, {pipeline_mode = #tpu.pipeline_mode<synchronous>, transform_indices = @transform_4, window_bounds = array<i64: 1, 32>}, {pipeline_mode = #tpu.pipeline_mode<synchronous>, transform_indices = @transform_5, window_bounds = array<i64: 32, 32>}, {pipeline_mode = #tpu.pipeline_mode<synchronous>, transform_indices = @transform_6, window_bounds = array<i64: 1, 32>}, {pipeline_mode = #tpu.pipeline_mode<synchronous>, transform_indices = @transform_7, window_bounds = array<i64: 32, 128>}, {pipeline_mode = #tpu.pipeline_mode<synchronous>, transform_indices = @transform_8, window_bounds = array<i64: 1, 128>}, {transform_indices = @transform_9, window_bounds = array<i64: 8, 8>}, {transform_indices = @transform_10, window_bounds = array<i64: 8, 128>}]} {
    %c0 = arith.constant 0 : index
    %c0_0 = arith.constant 0 : index
    %0 = vector.load %arg1[%c0, %c0_0] : memref<8x12xbf16, #tpu.memory_space<vmem>>, vector<8x12xbf16>
    %c0_1 = arith.constant 0 : index
    %c0_2 = arith.constant 0 : index
    %1 = vector.load %arg3[%c0_1, %c0_2] : memref<12x32xbf16, #tpu.memory_space<vmem>>, vector<12x32xbf16>
    %cst = arith.constant dense<0.000000e+00> : vector<8x32xf32>
    %2 = tpu.matmul %0, %1, %cst {dimension_numbers = #tpu.dot_dimension_numbers<[1], [0], [0], [1], [0, 0, 1, 1], [], []>} : vector<8x12xbf16>, vector<12x32xbf16>, vector<8x32xf32> -> vector<8x32xf32>
    %c0_3 = arith.constant 0 : index
    %c0_4 = arith.constant 0 : index
    %3 = vector.load %arg2[%c0_3, %c0_4] : memref<8x20xbf16, #tpu.memory_space<vmem>>, vector<8x20xbf16>
    %c0_5 = arith.constant 0 : index
    %c0_6 = arith.constant 0 : index
    %4 = vector.load %arg4[%c0_5, %c0_6] : memref<20x32xbf16, #tpu.memory_space<vmem>>, vector<20x32xbf16>
    %cst_7 = arith.constant dense<0.000000e+00> : vector<8x32xf32>
    %5 = tpu.matmul %3, %4, %cst_7 {dimension_numbers = #tpu.dot_dimension_numbers<[1], [0], [0], [1], [0, 0, 1, 1], [], []>} : vector<8x20xbf16>, vector<20x32xbf16>, vector<8x32xf32> -> vector<8x32xf32>
    %6 = arith.addf %2, %5 : vector<8x32xf32>
    %c0_8 = arith.constant 0 : index
    %c0_9 = arith.constant 0 : index
    %7 = vector.load %arg5[%c0_8, %c0_9] : memref<1x32xf32, #tpu.memory_space<vmem>>, vector<1x32xf32>
    %8 = vector.broadcast %7 : vector<1x32xf32> to vector<8x32xf32>
    %9 = arith.addf %6, %8 : vector<8x32xf32>
    %10 = math.tanh %9 : vector<8x32xf32>
    %11 = arith.truncf %10 : vector<8x32xf32> to vector<8x32xbf16>
    %c0_10 = arith.constant 0 : index
    %c0_11 = arith.constant 0 : index
    %12 = vector.load %arg6[%c0_10, %c0_11] : memref<32x32xbf16, #tpu.memory_space<vmem>>, vector<32x32xbf16>
    %cst_12 = arith.constant dense<0.000000e+00> : vector<8x32xf32>
    %13 = tpu.matmul %11, %12, %cst_12 {dimension_numbers = #tpu.dot_dimension_numbers<[1], [0], [0], [1], [0, 0, 1, 1], [], []>} : vector<8x32xbf16>, vector<32x32xbf16>, vector<8x32xf32> -> vector<8x32xf32>
    %c0_13 = arith.constant 0 : index
    %c0_14 = arith.constant 0 : index
    %14 = vector.load %arg7[%c0_13, %c0_14] : memref<1x32xf32, #tpu.memory_space<vmem>>, vector<1x32xf32>
    %15 = vector.broadcast %14 : vector<1x32xf32> to vector<8x32xf32>
    %16 = arith.addf %13, %15 : vector<8x32xf32>
    %17 = math.tanh %16 : vector<8x32xf32>
    %18 = arith.truncf %17 : vector<8x32xf32> to vector<8x32xbf16>
    %c0_15 = arith.constant 0 : index
    %c0_16 = arith.constant 0 : index
    %19 = vector.load %arg8[%c0_15, %c0_16] : memref<32x128xbf16, #tpu.memory_space<vmem>>, vector<32x128xbf16>
    %cst_17 = arith.constant dense<0.000000e+00> : vector<8x128xf32>
    %20 = tpu.matmul %18, %19, %cst_17 {dimension_numbers = #tpu.dot_dimension_numbers<[1], [0], [0], [1], [0, 0, 1, 1], [], []>} : vector<8x32xbf16>, vector<32x128xbf16>, vector<8x128xf32> -> vector<8x128xf32>
    %c0_18 = arith.constant 0 : index
    %c0_19 = arith.constant 0 : index
    %21 = vector.load %arg9[%c0_18, %c0_19] : memref<1x128xf32, #tpu.memory_space<vmem>>, vector<1x128xf32>
    %22 = vector.broadcast %21 : vector<1x128xf32> to vector<8x128xf32>
    %23 = arith.addf %20, %22 : vector<8x128xf32>
    %c0_20 = arith.constant 0 : index
    %c0_21 = arith.constant 0 : index
    %24 = vector.load %arg11[%c0_20, %c0_21] : memref<8x128xf32, #tpu.memory_space<vmem>>, vector<8x128xf32>
    tpu.vector_store %arg11[%c0_20, %c0_21], %23 {strides = array<i32>} : memref<8x128xf32, #tpu.memory_space<vmem>>, vector<8x128xf32>,
    %25 = vector.extract_strided_slice %23 {offsets = [0, 0], sizes = [8, 8], strides = [1, 1]} : vector<8x128xf32> to vector<8x8xf32>
    %c0_22 = arith.constant 0 : index
    %c0_23 = arith.constant 0 : index
    %26 = vector.load %arg10[%c0_22, %c0_23] : memref<8x8xf32, #tpu.memory_space<vmem>>, vector<8x8xf32>
    %cst_24 = arith.constant 5.000000e-01 : f32
    %27 = vector.broadcast %cst_24 : f32 to vector<8x8xf32>
    %28 = arith.cmpf ogt, %26, %27 : vector<8x8xf32>
    %cst_25 = arith.constant -1.000000e+09 : f32
    %29 = vector.broadcast %cst_25 : f32 to vector<8x8xf32>
    %30 = arith.select %28, %25, %29 : vector<8x8xi1>, vector<8x8xf32>
    %31 = tpu.iota {dimensions = array<i32: 1>} : vector<8x8xi32>
    %32 = vector.extract_strided_slice %30 {offsets = [0, 0], sizes = [8, 3], strides = [1, 1]} : vector<8x8xf32> to vector<8x3xf32>
    %33 = vector.extract_strided_slice %31 {offsets = [0, 0], sizes = [8, 3], strides = [1, 1]} : vector<8x8xi32> to vector<8x3xi32>
    %c0_i32 = arith.constant 0 : i32
    %34 = vector.broadcast %c0_i32 : i32 to vector<8x3xi32>
    %35 = arith.subi %33, %34 : vector<8x3xi32>
    %cst_26 = arith.constant dense<0xFF800000> : vector<8xf32>
    %36 = vector.multi_reduction <maximumf>, %32, %cst_26 [1] : vector<8x3xf32> to vector<8xf32>
    %37 = vector.shape_cast %36 : vector<8xf32> to vector<8x1xf32>
    %38 = vector.broadcast %37 : vector<8x1xf32> to vector<8x3xf32>
    %39 = arith.cmpf oeq, %32, %38 : vector<8x3xf32>
    %c3_i32 = arith.constant 3 : i32
    %40 = vector.broadcast %c3_i32 : i32 to vector<8x3xi32>
    %41 = arith.select %39, %35, %40 : vector<8x3xi1>, vector<8x3xi32>
    %cst_27 = arith.constant dense<2147483647> : vector<8xi32>
    %42 = vector.multi_reduction <minsi>, %41, %cst_27 [1] : vector<8x3xi32> to vector<8xi32>
    %43 = vector.shape_cast %42 : vector<8xi32> to vector<8x1xi32>
    %44 = vector.extract_strided_slice %30 {offsets = [0, 3], sizes = [8, 5], strides = [1, 1]} : vector<8x8xf32> to vector<8x5xf32>
    %45 = vector.extract_strided_slice %31 {offsets = [0, 3], sizes = [8, 5], strides = [1, 1]} : vector<8x8xi32> to vector<8x5xi32>
    %c3_i32_28 = arith.constant 3 : i32
    %46 = vector.broadcast %c3_i32_28 : i32 to vector<8x5xi32>
    %47 = arith.subi %45, %46 : vector<8x5xi32>
    %cst_29 = arith.constant dense<0xFF800000> : vector<8xf32>
    %48 = vector.multi_reduction <maximumf>, %44, %cst_29 [1] : vector<8x5xf32> to vector<8xf32>
    %49 = vector.shape_cast %48 : vector<8xf32> to vector<8x1xf32>
    %50 = vector.broadcast %49 : vector<8x1xf32> to vector<8x5xf32>
    %51 = arith.cmpf oeq, %44, %50 : vector<8x5xf32>
    %c5_i32 = arith.constant 5 : i32
    %52 = vector.broadcast %c5_i32 : i32 to vector<8x5xi32>
    %53 = arith.select %51, %47, %52 : vector<8x5xi1>, vector<8x5xi32>
    %cst_30 = arith.constant dense<2147483647> : vector<8xi32>
    %54 = vector.multi_reduction <minsi>, %53, %cst_30 [1] : vector<8x5xi32> to vector<8xi32>
    %55 = vector.shape_cast %54 : vector<8xi32> to vector<8x1xi32>
    %56 = tpu.concatenate %43, %55 in 1 : vector<8x1xi32>, vector<8x1xi32> -> vector<8x2xi32>
    %57 = arith.sitofp %56 : vector<8x2xi32> to vector<8x2xf32>
    %c0_31 = arith.constant 0 : index
    %c8 = arith.constant 8 : index
    %58 = vector.load %arg11[%c0_31, %c8] : memref<8x128xf32, #tpu.memory_space<vmem>>, vector<8x2xf32>
    tpu.vector_store %arg11[%c0_31, %c8], %57 {strides = array<i32>} : memref<8x128xf32, #tpu.memory_space<vmem>>, vector<8x2xf32>,
    return
  }
  func.func @transform_0(%arg0: i32) -> (i32, i32) {
    %c0_i32 = arith.constant 0 : i32
    %c0_i32_0 = arith.constant 0 : i32
    return %arg0, %c0_i32 : i32, i32
  }
  func.func @transform_1(%arg0: i32) -> (i32, i32) {
    %c0_i32 = arith.constant 0 : i32
    %c0_i32_0 = arith.constant 0 : i32
    return %arg0, %c0_i32 : i32, i32
  }
  func.func @transform_2(%arg0: i32) -> (i32, i32) {
    %c0_i32 = arith.constant 0 : i32
    %c0_i32_0 = arith.constant 0 : i32
    %c0_i32_1 = arith.constant 0 : i32
    return %c0_i32, %c0_i32_0 : i32, i32
  }
  func.func @transform_3(%arg0: i32) -> (i32, i32) {
    %c0_i32 = arith.constant 0 : i32
    %c0_i32_0 = arith.constant 0 : i32
    %c0_i32_1 = arith.constant 0 : i32
    return %c0_i32, %c0_i32_0 : i32, i32
  }
  func.func @transform_4(%arg0: i32) -> (i32, i32) {
    %c0_i32 = arith.constant 0 : i32
    %c0_i32_0 = arith.constant 0 : i32
    %c0_i32_1 = arith.constant 0 : i32
    return %c0_i32, %c0_i32_0 : i32, i32
  }
  func.func @transform_5(%arg0: i32) -> (i32, i32) {
    %c0_i32 = arith.constant 0 : i32
    %c0_i32_0 = arith.constant 0 : i32
    %c0_i32_1 = arith.constant 0 : i32
    return %c0_i32, %c0_i32_0 : i32, i32
  }
  func.func @transform_6(%arg0: i32) -> (i32, i32) {
    %c0_i32 = arith.constant 0 : i32
    %c0_i32_0 = arith.constant 0 : i32
    %c0_i32_1 = arith.constant 0 : i32
    return %c0_i32, %c0_i32_0 : i32, i32
  }
  func.func @transform_7(%arg0: i32) -> (i32, i32) {
    %c0_i32 = arith.constant 0 : i32
    %c0_i32_0 = arith.constant 0 : i32
    %c0_i32_1 = arith.constant 0 : i32
    return %c0_i32, %c0_i32_0 : i32, i32
  }
  func.func @transform_8(%arg0: i32) -> (i32, i32) {
    %c0_i32 = arith.constant 0 : i32
    %c0_i32_0 = arith.constant 0 : i32
    %c0_i32_1 = arith.constant 0 : i32
    return %c0_i32, %c0_i32_0 : i32, i32
  }
  func.func @transform_9(%arg0: i32) -> (i32, i32) {
    %c0_i32 = arith.constant 0 : i32
    %c0_i32_0 = arith.constant 0 : i32
    return %arg0, %c0_i32 : i32, i32
  }
  func.func @transform_10(%arg0: i32) -> (i32, i32) {
    %c0_i32 = arith.constant 0 : i32
    %c0_i32_0 = arith.constant 0 : i32
    return %arg0, %c0_i32 : i32, i32
  }
}

</mosaic_0001>

<bundles_post_ra>
// kernel: tpu_custom_call.1
= control target key start
LH: loop header
LB: loop body
LE: loop exit
PB: predicated region body
PF: predicated region fallthrough
CT: control target
= control target key end

     0   :  { %15 = vsyncpa [#allocation3], 0  ;;  %s829_s0 = inlined_call_operand.hbm [shape: bf16[8,12], index: 0, kind: input, shape index: {}]   ;;  %s830_s1 = inlined_call_operand.hbm [shape: bf16[8,20], index: 1, kind: input, shape index: {}]   ;;  %s831_s2 = inlined_call_operand.hbm [shape: bf16[12,32], index: 2, kind: input, shape index: {}]   ;;  %s832_s3 = inlined_call_operand.hbm [shape: bf16[20,32], index: 3, kind: input, shape index: {}]   ;;  %s833_s4 = inlined_call_operand.vmem [shape: f32[1,32], index: 4, kind: input, shape index: {}]   ;;  %s834_s5 = inlined_call_operand.vmem [shape: bf16[32,32], index: 5, kind: input, shape index: {}]   ;;  %s835_s6 = inlined_call_operand.vmem [shape: f32[1,32], index: 6, kind: input, shape index: {}]   ;;  %s836_s7 = inlined_call_operand.hbm [shape: bf16[32,128], index: 7, kind: input, shape index: {}]   ;;  %s837_s8 = inlined_call_operand.vmem [shape: f32[1,128], index: 8, kind: input, shape index: {}]   ;;  %s838_s9 = inlined_call_operand.vmem [shape: f32[8,8], index: 9, kind: input, shape index: {}]   ;;  %s839_s10 = inlined_call_operand.hbm [shape: f32[8,128], index: 10, kind: output, shape index: {}]  }
   0x1   :  { %16 = vsyncpa [#allocation6], 0 }
   0x2   :  { %17 = vsyncpa [#allocation9], 0 }
   0x3   :  { %18 = vsyncpa [#allocation4], 0  ;;  %s656_s13 = smov [#allocation5]   ;;  %s516_s17 = scalar_lea.hbm %s830_s1, 64 }
   0x4   :  { %s35_s14 = sshll.u32 %s656_s13, 4  ;;  %p517_p0 = scmp.ne.s32.totalorder %s830_s1, %s516_s17  ;;  %s36_s14 = int_to_ptr.vmem [resolvable:$true] %s35_s14 }
   0x5   :  { %p520_p1 = scmp.lt.u32.totalorder %s516_s17, %s830_s1 }
   0x7   :  { %p522_p2 = pnand %p520_p1, %p517_p0 }
   0x9   :  { %525 = shalt.err (!%p522_p2)
}
   0xa   :  { %s526_s22 = scalar_lea.vmem %s36_s14, 64  ;;  %p531_p4 = scmp.lt.s32.totalorder %s36_s14, %s36_s14 }
   0xb   :  { %p527_p3 = scmp.ne.s32.totalorder %s36_s14, %s526_s22  ;;  %p532_p5 = scmp.lt.s32.totalorder %s526_s22, %s526_s22 }
   0xd   :  { %p533_p6 = por %p532_p5, %p531_p4 }
   0xf   :  { %p534_p7 = pnand %p533_p6, %p527_p3 }
  0x11   :  { %537 = shalt.err (!%p534_p7)
}
  0x12   :  { %38 = dma.hbm_to_vmem [thread:$0]  %s830_s1, 64, %s36_s14, [#allocation6]  }
  0x13   :  { %s657_s25 = smov [#allocation8]   ;;  %s658_s27 = smov [#allocation2]  }
  0x14   :  { %s56_s26 = sshll.u32 %s657_s25, 4  ;;  %s25_s28 = sshll.u32 %s658_s27, 4  ;;  %s57_s26 = int_to_ptr.vmem [resolvable:$true] %s56_s26  ;;  %s26_s28 = int_to_ptr.vmem [resolvable:$true] %s25_s28 }
  0x15   :  { %s538_s11 = scalar_lea.hbm %s832_s3, 192 }
  0x16   :  { %p539_p8 = scmp.ne.s32.totalorder %s832_s3, %s538_s11  ;;  %p542_p9 = scmp.lt.u32.totalorder %s538_s11, %s832_s3 }
  0x18   :  { %p544_p10 = pnand %p542_p9, %p539_p8 }
  0x1a   :  { %547 = shalt.err (!%p544_p10)
}
  0x1b   :  { %s548_s1 = scalar_lea.vmem %s57_s26, 192  ;;  %p553_p12 = scmp.lt.s32.totalorder %s57_s26, %s57_s26 }
  0x1c   :  { %p549_p11 = scmp.ne.s32.totalorder %s57_s26, %s548_s1  ;;  %p554_p13 = scmp.lt.s32.totalorder %s548_s1, %s548_s1 }
  0x1e   :  { %p555_p0 = por %p554_p13, %p553_p12 }
  0x20   :  { %p556_p1 = pnand %p555_p0, %p549_p11 }
  0x22   :  { %559 = shalt.err (!%p556_p1)
}
  0x23   :  { %s659_s14 = smov 64   ;;  %s660_s17 = smov 4  }
  0x24   :  { %62 = dma.hbm_to_vmem [thread:$0]  %s832_s3, 192, %s57_s26, [#allocation9], %s659_s14, %s659_s14, %s660_s17  }
  0x25   :  { %s560_s22 = scalar_lea.hbm %s829_s0, 64 }
  0x26   :  { %p561_p2 = scmp.ne.s32.totalorder %s829_s0, %s560_s22  ;;  %p564_p3 = scmp.lt.u32.totalorder %s560_s22, %s829_s0 }
  0x28   :  { %p566_p4 = pnand %p564_p3, %p561_p2 }
  0x2a   :  { %569 = shalt.err (!%p566_p4)
}
  0x2b   :  { %s570_s29 = scalar_lea.vmem %s26_s28, 64  ;;  %p575_p6 = scmp.lt.s32.totalorder %s26_s28, %s26_s28 }
  0x2c   :  { %p571_p5 = scmp.ne.s32.totalorder %s26_s28, %s570_s29  ;;  %p576_p7 = scmp.lt.s32.totalorder %s570_s29, %s570_s29 }
  0x2e   :  { %p577_p8 = por %p576_p7, %p575_p6 }
  0x30   :  { %p578_p9 = pnand %p577_p8, %p571_p5 }
  0x32   :  { %581 = shalt.err (!%p578_p9)
}
  0x33   :  { %28 = dma.hbm_to_vmem [thread:$0]  %s829_s0, 64, %s26_s28, [#allocation3]  }
  0x34   :  { %s661_s30 = smov [#allocation7]   ;;  %s662_s12 = smov [#allocation10]  }
  0x35   :  { %s44_s11 = sshll.u32 %s661_s30, 4  ;;  %s74_s13 = sshll.u32 %s662_s12, 4  ;;  %s45_s11 = int_to_ptr.vmem [resolvable:$true] %s44_s11  ;;  %s75_s13 = int_to_ptr.vmem [resolvable:$true] %s74_s13 }
  0x36   :  { %s582_s1 = scalar_lea.hbm %s831_s2, 128 }
  0x37   :  { %p583_p10 = scmp.ne.s32.totalorder %s831_s2, %s582_s1  ;;  %p586_p11 = scmp.lt.u32.totalorder %s582_s1, %s831_s2 }
  0x39   :  { %p588_p12 = pnand %p586_p11, %p583_p10 }
  0x3b   :  { %591 = shalt.err (!%p588_p12)
}
  0x3c   :  { %s592_s0 = scalar_lea.vmem %s45_s11, 128  ;;  %p597_p0 = scmp.lt.s32.totalorder %s45_s11, %s45_s11 }
  0x3d   :  { %p593_p13 = scmp.ne.s32.totalorder %s45_s11, %s592_s0  ;;  %p598_p1 = scmp.lt.s32.totalorder %s592_s0, %s592_s0 }
  0x3f   :  { %p599_p2 = por %p598_p1, %p597_p0 }
  0x41   :  { %p600_p3 = pnand %p599_p2, %p593_p13 }
  0x43   :  { %603 = shalt.err (!%p600_p3)
}
  0x44   :  { %50 = dma.hbm_to_vmem [thread:$0]  %s831_s2, 128, %s45_s11, [#allocation6], %s659_s14, %s659_s14, %s660_s17  }
  0x45   :  { %s604_s25 = scalar_lea.hbm %s836_s7, 256 }
  0x46   :  { %p605_p4 = scmp.ne.s32.totalorder %s836_s7, %s604_s25  ;;  %p608_p5 = scmp.lt.u32.totalorder %s604_s25, %s836_s7 }
  0x48   :  { %p610_p6 = pnand %p608_p5, %p605_p4 }
  0x4a   :  { %613 = shalt.err (!%p610_p6)
}
  0x4b   :  { %s614_s30 = scalar_lea.vmem %s75_s13, 256  ;;  %p619_p8 = scmp.lt.s32.totalorder %s75_s13, %s75_s13 }
  0x4c   :  { %p615_p7 = scmp.ne.s32.totalorder %s75_s13, %s614_s30  ;;  %p620_p9 = scmp.lt.s32.totalorder %s614_s30, %s614_s30 }
  0x4e   :  { %p621_p10 = por %p620_p9, %p619_p8 }
  0x50   :  { %p622_p11 = pnand %p621_p10, %p615_p7 }
  0x52   :  { %625 = shalt.err (!%p622_p11)
}
  0x53   :  { %80 = dma.hbm_to_vmem [thread:$0]  %s836_s7, 256, %s75_s13, [#allocation9], %s659_s14, %s659_s14, %s660_s17  }
  0x54   :  { %648 = dma.done.wait [#allocation3], 64  }
  0x55   :  { %649 = vsyncadd [#allocation3], 4294967232 }
  0x56   :  { %650 = dma.done.wait [#allocation6], 192  }
  0x57   :  { %651 = vsyncadd [#allocation6], 4294967104 }
  0x58   :  { %652 = dma.done.wait [#allocation9], 448  }
  0x59   :  { %653 = vsyncadd [#allocation9], 4294966848  ;;  %v663_v0 = vmov 0.0   ;;  %vm664_vm0 = vmmov 0   ;;  %vm174_vm1 = vcmask 1045504   ;;  %v505_v1 = vld [vmem:[#allocation8] sm:$0xff]   ;;  %v367_v43 = vlaneseq }
  0x5a   :  { %464 = vmatprep.subr.bf16.mxu0 %v663_v0  ;;  %472 = vmatprep.subr.bf16.mxu1 %v663_v0  ;;  %vm121_vm2 = vcmask 1041408   ;;  %v506_v2 = vld [vmem:[#allocation7] sm:$0x3f]   ;;  %v507_v3 = vld [vmem:[#allocation8 + $0x8] ss:$0 sps:$4 sm:$0x33]  }
  0x5b   :  { %474 = vmatprep.mubr.msk.bf16.mxu1 %vm664_vm0, %v663_v0  ;;  %468 = vmatprep.mubr.msk.bf16.mxu0 %vm664_vm0, %v663_v0  ;;  %v176_v4 = vsel %vm174_vm1, %v506_v2, 0  ;;  %v101_v5 = vld [vmem:[#allocation2] sm:$0xf]  ;;  %vm170_vm3 = vcmask 97280   ;;  %v123_v6 = vsel %vm121_vm2, %v507_v3, 0  ;;  %vm117_vm4 = vcmask 162816  }
  0x5c   :  { %465 = vmatpush3.bf16.msra.mxu0 %v505_v1  ;;  %473 = vmatpush3.bf16.msra.mxu1 %v176_v4  ;;  %v104_v7 = vld [vmem:[#allocation5] sm:$0xf]  ;;  %v508_v8 = vld [vmem:[%s834_s5] sm:$0xff]   ;;  %v509_v9 = vld [vmem:[%s834_s5 + $0x8] sm:$0xff]   ;;  %vm251_vm5 = vcmask 261120   ;;  %vm369_vm7 = vcmask 23552  }
  0x5d   :  { %466 = vmatprep.subr.bf16.mxu0 %v663_v0  ;;  %478 = vmatprep.subr.bf16.mxu1 %v663_v0  ;;  %v443_v14 = vld [vmem:[%s833_s4] ss:$0 sm:$0xff]  ;;  %v510_v23 = vld [vmem:[#allocation10] sm:$0xff]   ;;  %vm391_vm8 = vcmask 64536   ;;  %v368_v44 = vand.u32 127, %v367_v43  ;;  %vm412_vm13 = vcmask 7168  }
  0x5e   :  { %v511_v24 = vld [vmem:[#allocation10 + $0x8] sm:$0xff]   ;;  %vm419_vm14 = vcmask 80960  }
  0x5f   :  { %475 = vmatmul.mubr.msk.bf16.vlgmr.msra.gmra.mrb[0].mxu1 %vm170_vm3, %v101_v5  ;;  %v444_v25 = vld [vmem:[%s835_s6] ss:$0 sm:$0xff]  ;;  %v452_v47 = vadd.s32 4294967293, %v368_v44  ;;  %s665_s6 = smov 8  }
  0x60   :  { %467 = vmatpush3.bf16.msra.mxu0 %v123_v6  ;;  %482 = vmatprep.mubr.msk.bf16.mxu1 %vm664_vm0, %v663_v0  ;;  %v364_v33 = vld [vmem:[%s838_s9] sm:$0xff] }
  0x61   :  { %486 = vmatprep.subr.bf16.mxu0 %v663_v0  ;;  %479 = vmatpush3.bf16.msra.mxu1 %v508_v8  ;;  %v448_v34 = vld [vmem:[%s837_s8] ss:$0 sm:$0xff]  ;;  %vm365_vm6 = vcmp.gt.f32.partialorder %v364_v33, 0.5  ;;  %s666_s8 = smov [#allocation11]  }
  0x62   :  { %480 = vmatprep.subr.bf16.mxu1 %v663_v0  ;;  %s427_s9 = sshll.u32 %s666_s8, 4  ;;  %s428_s9 = int_to_ptr.vmem [resolvable:$true] %s427_s9 }
  0x63   :  { %469 = vmatmul.mubr.msk.bf16.vlgmr.msra.gmra.mrb[0].mxu0 %vm117_vm4, %v104_v7  ;;  %s626_s20 = scalar_lea.vmem %s428_s9, 128  ;;  %p631_p13 = scmp.lt.s32.totalorder %s428_s9, %s428_s9 }
  0x64   :  { %490 = vmatprep.mubr.msk.bf16.mxu0 %vm664_vm0, %v663_v0  ;;  %487 = vmatpush3.bf16.msra.mxu0 %v510_v23  ;;  %p627_p12 = scmp.ne.s32.totalorder %s428_s9, %s626_s20  ;;  %p632_p0 = scmp.lt.s32.totalorder %s626_s20, %s626_s20 }
  0x65   :  { %481 = vmatpush3.bf16.msra.mxu1 %v509_v9  ;;  %488 = vmatprep.subr.bf16.mxu0 %v663_v0 }
  0x66   :  { %p633_p1 = por %p632_p0, %p631_p13 }
  0x68   :  { %489 = vmatpush3.bf16.msra.mxu0 %v511_v24  ;;  %p634_p2 = pnand %p633_p1, %p627_p12 }
 0x132   :  { %v212_v10 = vpop.f32.mrb[0].mxu1 }
 0x133   :  { %v476_v11 = vpop.f32.mrb[1].mxu1 }
 0x134   :  { %v215_v12 = vpop.f32.mrb[2].mxu1 }
 0x135   :  { %v477_v16 = vpop.f32.mrb[3].mxu1 }
 0x136   :  { %v159_v13 = vpop.f32.mrb[0].mxu0 }
 0x137   :  { %v213_v15 = vadd.f32 %v212_v10, %v159_v13  ;;  %v470_v17 = vpop.f32.mrb[1].mxu0 }
 0x138   :  { %v162_v18 = vpop.f32.mrb[2].mxu0 }
 0x139   :  { %v225_v19 = vadd.f32 %v443_v14, %v213_v15  ;;  %v471_v20 = vpop.f32.mrb[3].mxu0 }
 0x13b   :  { %512 = vtanh.f32 %v225_v19 }
 0x145   :  { %v513_v21 = vpop.eup %512 }
 0x146   :  { %v227_v22 = vpack.c.bf16 %v513_v21, %v513_v21 }
 0x148   :  { %483 = vmatmul.mubr.msk.bf16.vlgmr.msra.gmra.mrb[4].mxu1 %vm251_vm5, %v227_v22 }
 0x21b   :  { %v289_v26 = vpop.f32.mrb[4].mxu1 }
 0x21c   :  { %v290_v27 = vadd.f32 %v444_v25, %v289_v26  ;;  %v484_v28 = vpop.f32.mrb[5].mxu1 }
 0x21d   :  { %v292_v29 = vpop.f32.mrb[6].mxu1 }
 0x21e   :  { %514 = vtanh.f32 %v290_v27  ;;  %v485_v30 = vpop.f32.mrb[7].mxu1 }
 0x228   :  { %v515_v31 = vpop.eup %514 }
 0x229   :  { %v296_v32 = vpack.c.bf16 %v515_v31, %v515_v31 }
 0x22b   :  { %491 = vmatmul.mubr.msk.bf16.vlgmr.msra.gmra.mrb[4].mxu0 %vm251_vm5, %v296_v32 }
 0x2fe   :  { %v357_v35 = vpop.f32.mrb[4].mxu0 }
 0x2ff   :  { %v358_v36 = vadd.f32 %v448_v34, %v357_v35  ;;  %v492_v37 = vpop.f32.mrb[5].mxu0 }
 0x300   :  { %v360_v38 = vpop.f32.mrb[6].mxu0 }
 0x301   :  { %363 = vst [vmem:[#allocation11] sm:$0xff] %v358_v36  ;;  %v366_v39 = vsel %vm365_vm6, %v358_v36, -1e+09  ;;  %v493_v40 = vpop.f32.mrb[7].mxu0 }
 0x302   :  { %v370_v41 = vsel %vm369_vm7, %v366_v39, -inf  ;;  %v392_v42 = vsel %vm391_vm8, %v366_v39, -inf }
 0x303   :  { %371 = vmax.xlane.f32.xlu0 %v370_v41 }
 0x307   :  { %393 = vmax.xlane.f32.xlu0 %v392_v42 }
 0x390   :  { %v372_v45 = vpop.xlane.xlu0 %371 }
 0x391   :  { %vm373_vm9 = vcmp.eq.f32.partialorder %v366_v39, %v372_v45 }
 0x392   :  { %v374_v46 = vsel %vm373_vm9, %v368_v44, 3 }
 0x393   :  { %v375_v48 = vsel %vm369_vm7, %v374_v46, 2147483647 }
 0x394   :  { %v394_v49 = vpop.xlane.xlu0 %393  ;;  %v377_v50 = vshra.s32 %v375_v48, 16  ;;  %v376_v56 = vand.u32 65535, %v375_v48 }
 0x395   :  { %vm395_vm10 = vcmp.eq.f32.partialorder %v366_v39, %v394_v49 }
 0x396   :  { %v396_v51 = vsel %vm395_vm10, %v452_v47, 5  ;;  %v379_v52 = vcvt.s32.f32 %v377_v50  ;;  %v378_v58 = vcvt.s32.f32 %v376_v56 }
 0x397   :  { %v397_v53 = vsel %vm391_vm8, %v396_v51, 2147483647 }
 0x398   :  { %380 = vmin.xlane.f32.xlu1 %v379_v52  ;;  %v399_v54 = vshra.s32 %v397_v53, 16  ;;  %v398_v59 = vand.u32 65535, %v397_v53 }
 0x39a   :  { %v401_v55 = vcvt.s32.f32 %v399_v54  ;;  %v400_v62 = vcvt.s32.f32 %v398_v59 }
 0x39c   :  { %402 = vmin.xlane.f32.xlu1 %v401_v55 }
 0x425   :  { %v381_v57 = vpop.xlane.xlu1 %380 }
 0x426   :  { %vm382_vm11 = vcmp.eq.f32.partialorder %v379_v52, %v381_v57  ;;  %v387_v1 = vcvt.f32.s32 %v381_v57 }
 0x427   :  { %v383_v60 = vsel %vm382_vm11, %v378_v58, inf }
 0x428   :  { %384 = vmin.xlane.f32.xlu0 %v383_v60  ;;  %v388_v5 = vshll.u32 %v387_v1, 16 }
 0x429   :  { %v403_v61 = vpop.xlane.xlu1 %402 }
 0x42a   :  { %vm404_vm12 = vcmp.eq.f32.partialorder %v401_v55, %v403_v61  ;;  %v409_v2 = vcvt.f32.s32 %v403_v61 }
 0x42b   :  { %v405_v63 = vsel %vm404_vm12, %v400_v62, inf }
 0x42c   :  { %406 = vmin.xlane.f32.xlu1 %v405_v63  ;;  %v410_v6 = vshll.u32 %v409_v2, 16 }
 0x4b5   :  { %v385_v0 = vpop.xlane.xlu0 %384 }
 0x4b6   :  { %v386_v3 = vcvt.f32.s32 %v385_v0 }
 0x4b8   :  { %v389_v8 = vadd.s32 %v388_v5, %v386_v3 }
 0x4b9   :  { %v407_v4 = vpop.xlane.xlu1 %406 }
 0x4ba   :  { %v408_v7 = vcvt.f32.s32 %v407_v4 }
 0x4bc   :  { %v411_v9 = vadd.s32 %v410_v6, %v408_v7 }
 0x4be   :  { %v413_v10 = vsel %vm412_vm13, %v389_v8, %v411_v9 }
 0x4bf   :  { %v414_v11 = vcvt.s32.f32 %v413_v10 }
 0x4c1   :  { %416 = vrot.lane.b32.xlu0 %v414_v11, %s665_s6 }
 0x533   :  { %v417_v12 = vpop.permute.xlu0 %416 }
 0x534   :  { %420 = vst.msk [vmem:[#allocation11] sm:$0xff] %vm419_vm14, %v417_v12 }
 0x535   :  { %637 = shalt.err (!%p634_p2)
}
 0x536   :  { %s638_s28 = scalar_lea.hbm %s839_s10, 128 }
 0x537   :  { %p639_p3 = scmp.ne.s32.totalorder %s839_s10, %s638_s28  ;;  %p642_p4 = scmp.lt.u32.totalorder %s638_s28, %s839_s10 }
 0x539   :  { %p644_p5 = pnand %p642_p4, %p639_p3 }
 0x53b   :  { %647 = shalt.err (!%p644_p5)
}
 0x53c   :  { %430 = dma.vmem_to_hbm [thread:$0]  %s428_s9, 128, %s839_s10, [#allocation4]  }
 0x53d   :  { %654 = dma.done.wait [#allocation4], 128  }
 0x53e   :  { %655 = vsyncadd [#allocation4], 4294967168 }
 0x53f   :  { %434 = vsyncpa [#allocation3], 1 }
 0x540   :  { %435 = vsyncpa [#allocation6], 1 }
 0x541   :  { %436 = vsyncpa [#allocation9], 1 }
 0x542   :  { %437 = vsyncpa [#allocation4], 1 }

</bundles_post_ra>
